<compile_context>
chip_gen: v5e
topology: v5e:2x2
jax: 0.10.0
libtpu: 0.0.40
codegen_flags: <defaults>
</compile_context>

<pallas_src>
import numpy as np
import jax
import jax.numpy as jnp
from jax.experimental import pallas as pl
from jax.experimental.pallas import tpu as pltpu


# --------------------------------------------------------------------------- #
# Deterministic parameter construction (librosa-compatible, no file loading)
# --------------------------------------------------------------------------- #
def _hz_to_mel(f):
    f = np.asarray(f, dtype=np.float64)
    f_sp = 200.0 / 3.0
    mels = f / f_sp
    min_log_hz = 1000.0
    min_log_mel = min_log_hz / f_sp
    logstep = np.log(6.4) / 27.0
    return np.where(
        f >= min_log_hz,
        min_log_mel + np.log(np.maximum(f, min_log_hz) / min_log_hz) / logstep,
        mels,
    )


def _mel_to_hz(m):
    m = np.asarray(m, dtype=np.float64)
    f_sp = 200.0 / 3.0
    freqs = m * f_sp
    min_log_hz = 1000.0
    min_log_mel = min_log_hz / f_sp
    logstep = np.log(6.4) / 27.0
    return np.where(
        m >= min_log_mel,
        min_log_hz * np.exp(logstep * (m - min_log_mel)),
        freqs,
    )


def mel_filterbank(sr, n_fft, n_mels, fmin, fmax):
    """librosa.filters.mel (slaney scale, slaney norm), shape [n_mels, n_fft//2+1]."""
    n_freq = n_fft // 2 + 1
    fftfreqs = np.linspace(0.0, sr / 2.0, n_freq)
    mel_pts = _mel_to_hz(np.linspace(_hz_to_mel(fmin), _hz_to_mel(fmax), n_mels + 2))
    fdiff = np.diff(mel_pts)
    ramps = mel_pts[:, None] - fftfreqs[None, :]
    lower = -ramps[:-2] / fdiff[:-1, None]
    upper = ramps[2:] / fdiff[1:, None]
    weights = np.maximum(0.0, np.minimum(lower, upper))
    enorm = 2.0 / (mel_pts[2: n_mels + 2] - mel_pts[:n_mels])
    weights = weights * enorm[:, None]
    return weights.astype(np.float32)


def hann_window(win_length):
    """torch.hann_window (periodic=True)."""
    n = np.arange(win_length, dtype=np.float64)
    return (0.5 - 0.5 * np.cos(2.0 * np.pi * n / win_length)).astype(np.float32)


def _round_up(x, m):
    return (x + m - 1) // m * m


def _cdiv(a, b):
    return -(-a // b)


# --------------------------------------------------------------------------- #
# Pallas kernel: in-kernel framing + windowed DFT power + mel projection + log10
# --------------------------------------------------------------------------- #
def _make_logmel_kernel(*, n_fft, hop, n_chunks, tf, k_mat, f_eff, min_amp,
                        compute_dtype):
    def kernel(blk_a_ref, blk_b_ref, dftw_ref, melt_ref, o_ref, frames_scr):
        # blk_a_ref : [1, TF, hop]     audio rows  j*TF .. j*TF+TF-1     (compute_dtype)
        # blk_b_ref : [1, TB, hop]     audio rows (j+1)*TF .. +TB-1      (compute_dtype)
        # dftw_ref  : [K_mat, 2*f_eff] window-folded cos|sin DFT         (compute_dtype)
        # melt_ref  : [f_eff, m_pad]   trimmed, zero-padded mel^T        (compute_dtype)
        # o_ref     : [1, TF, m_pad]   float32
        # frames_scr: [TF, K_mat]      VMEM scratch (compute_dtype)

        # ---- in-kernel framing: frame t of this tile = audio rows t .. t+n_chunks-1
        if k_mat > n_fft:
            frames_scr[:, n_fft:] = jnp.zeros((tf, k_mat - n_fft), dtype=compute_dtype)
        for k in range(n_chunks):
            w = min(hop, n_fft - k * hop)
            c0 = k * hop
            if k == 0:
                frames_scr[:, c0:c0 + w] = blk_a_ref[0, :, :w]
            else:
                frames_scr[: tf - k, c0:c0 + w] = blk_a_ref[0, k:, :w]
                frames_scr[tf - k:, c0:c0 + w] = blk_b_ref[0, :k, :w]

        # ---- windowed one-sided DFT (single fused MXU matmul -> re | im)
        reim = jnp.dot(frames_scr[...], dftw_ref[...],
                       preferred_element_type=jnp.float32)            # [TF, 2*f_eff] f32
        re = reim[:, :f_eff]
        im = reim[:, f_eff:]
        power = re * re + im * im                                      # [TF, f_eff] f32

        # ---- mel projection + log10(clamp)
        mel = jnp.dot(power.astype(compute_dtype), melt_ref[...],
                      preferred_element_type=jnp.float32)              # [TF, m_pad] f32
        o_ref[0, :, :] = jnp.log10(jnp.maximum(mel, min_amp))

    return kernel


def log_mel_features(raw_audio, length, *, sample_rate, n_fft, win_length,
                     hop_length, n_mels, f_min, f_max, min_amp, center=True,
                     compute_dtype=jnp.bfloat16, frame_tile=1024):
    """
    raw_audio: [B, T_samples] float32
    length:    [B] int32 (length in samples)
    returns:   features [B, T_frames, n_mels] float32, frame lengths [B] int32

    compute_dtype: matmul operand dtype (accumulation is always f32).  bf16 is the
    recommended setting for v5e/v6e/v7x MXUs; pass jnp.float32 for closest parity
    with the PyTorch f32 reference.
    frame_tile: frames per grid step (1024 is safe for v5e/v7x VMEM; v6e can use 2048).
    """
    B, T = raw_audio.shape
    hop = int(hop_length)
    n_freq = n_fft // 2 + 1
    cd_bytes = jnp.dtype(compute_dtype).itemsize

    # ---- constants (offline numpy) -------------------------------------------------
    mel_basis = mel_filterbank(sample_rate, n_fft, n_mels, f_min, f_max)   # [M, F]

    # Trim DFT columns to the mel filterbank's nonzero bin support (zero-weight bins
    # cannot affect the output); then pad to a 128-lane multiple.
    support = np.nonzero(mel_basis.max(axis=0) > 0.0)[0]
    if support.size == 0:
        f_lo, f_hi = 0, 1
    else:
        f_lo, f_hi = int(support[0]), int(support[-1]) + 1
    n_bins = f_hi - f_lo
    f_eff = _round_up(n_bins, 128)
    m_pad = _round_up(n_mels, 128)

    win = hann_window(win_length)
    lpad = (n_fft - win_length) // 2      # torch.stft centers a short window in n_fft
    window_full = np.zeros((n_fft,), dtype=np.float64)
    window_full[lpad:lpad + win_length] = win

    # Window-folded one-sided DFT, only the supported bins:  (f*w) @ C == f @ (diag(w) C)
    n_idx = np.arange(n_fft, dtype=np.float64)[:, None]
    f_idx = (np.arange(n_bins, dtype=np.float64) + f_lo)[None, :]
    ang = 2.0 * np.pi * n_idx * f_idx / n_fft
    cos_w = (np.cos(ang) * window_full[:, None]).astype(np.float32)
    sin_w = (np.sin(ang) * window_full[:, None]).astype(np.float32)

    k_mat = _round_up(n_fft, 128)        # MXU K dim (zero rows beyond n_fft)
    dft_w = np.zeros((k_mat, 2 * f_eff), dtype=np.float32)
    dft_w[:n_fft, :n_bins] = cos_w
    dft_w[:n_fft, f_eff:f_eff + n_bins] = sin_w

    melT = np.zeros((f_eff, m_pad), dtype=np.float32)
    melT[:n_bins, :n_mels] = mel_basis[:, f_lo:f_hi].T

    # ---- framing geometry -----------------------------------------------------------
    if center:
        pad_left = n_fft // 2
        n_frames = 1 + T // hop
    else:
        pad_left = 0
        n_frames = 1 + (T - n_fft) // hop
    n_chunks = _cdiv(n_fft, hop)                       # hop-wide audio rows per frame
    tb = _round_up(max(n_chunks - 1, 1), 16)           # overlap rows block (next tile)

    tf_cap = _round_up(n_frames, tb)
    if B == 1:
        # keep >= 2 grid steps when possible so both v7x TensorCores are used
        tf_cap = max(tb, _round_up(_cdiv(n_frames, 2), tb))
    tf = min(_round_up(frame_tile, tb), tf_cap)
    tf = max(tf, tb, _round_up(n_chunks, tb))          # multiple of tb (and of 16)
    num_ft = _cdiv(n_frames, tf)
    frames_padded = num_ft * tf
    rows_padded = frames_padded + tb

    # Row-reshaped audio [B, rows_padded, hop] in compute dtype (read ~once by kernel).
    total_samples = rows_padded * hop
    pad_right = total_samples - T - pad_left
    assert pad_right >= 0
    audio_rows = jnp.pad(raw_audio, ((0, 0), (pad_left, pad_right)))
    audio_rows = audio_rows.astype(compute_dtype).reshape(B, rows_padded, hop)

    dftw_j = jnp.asarray(dft_w).astype(compute_dtype)
    melt_j = jnp.asarray(melT).astype(compute_dtype)

    kernel = _make_logmel_kernel(
        n_fft=n_fft, hop=hop, n_chunks=n_chunks, tf=tf, k_mat=k_mat,
        f_eff=f_eff, min_amp=float(min_amp), compute_dtype=compute_dtype)

    n_steps = B * num_ft
    flops = n_steps * (2 * tf * k_mat * (2 * f_eff)      # DFT matmul
                       + 2 * tf * f_eff * m_pad          # mel matmul
                       + 3 * tf * f_eff)                 # power spectrum
    transcendentals = n_steps * tf * m_pad               # log10
    bytes_accessed = (B * rows_padded * hop * cd_bytes          # audio rows (view A)
                      + n_steps * tb * hop * cd_bytes           # overlap rows (view B)
                      + k_mat * 2 * f_eff * cd_bytes
                      + f_eff * m_pad * cd_bytes
                      + B * frames_padded * m_pad * 4)          # output

    tf_over_tb = tf // tb

    out = pl.pallas_call(
        kernel,
        out_shape=jax.ShapeDtypeStruct((B, frames_padded, m_pad), jnp.float32),
        grid=(B, num_ft),
        in_specs=[
            pl.BlockSpec((1, tf, hop), lambda b, j: (b, j, 0)),
            pl.BlockSpec((1, tb, hop), lambda b, j: (b, (j + 1) * tf_over_tb, 0)),
            pl.BlockSpec((k_mat, 2 * f_eff), lambda b, j: (0, 0)),
            pl.BlockSpec((f_eff, m_pad), lambda b, j: (0, 0)),
        ],
        out_specs=pl.BlockSpec((1, tf, m_pad), lambda b, j: (b, j, 0)),
        scratch_shapes=[pltpu.VMEM((tf, k_mat), compute_dtype)],
        compiler_params=pltpu.CompilerParams(
            dimension_semantics=("parallel", "parallel"),
            vmem_limit_bytes=40 * 1024 * 1024,   # safe under v7x's 64 MiB physical VMEM
        ),
        cost_estimate=pl.CostEstimate(
            flops=int(flops),
            transcendentals=int(transcendentals),
            bytes_accessed=int(bytes_accessed),
        ),
    )(audio_rows, audio_rows, dftw_j, melt_j)

    # Slice off frame-row padding and zero mel-column padding -> [B, T_frames, n_mels].
    features = out[:, :n_frames, :n_mels]

    # Frame-length bookkeeping (scalar glue, matches torch).
    if center:
        out_len = length // hop + 1
    else:
        out_len = (length - n_fft) // hop + 1
    return features, out_len.astype(jnp.int32)


# --------------------------------------------------------------------------- #
# Pure-numpy reference for correctness checking (float64)
# --------------------------------------------------------------------------- #
def _reference_logmel_numpy(raw_audio, *, sample_rate, n_fft, win_length,
                            hop_length, n_mels, f_min, f_max, min_amp, center):
    x = np.asarray(raw_audio, dtype=np.float64)
    _, T = x.shape
    if center:
        pad = n_fft // 2
        x = np.pad(x, ((0, 0), (pad, pad)))
        n_frames = 1 + T // hop_length
    else:
        n_frames = 1 + (T - n_fft) // hop_length
    win = hann_window(win_length).astype(np.float64)
    lpad = (n_fft - win_length) // 2
    wfull = np.zeros((n_fft,), dtype=np.float64)
    wfull[lpad:lpad + win_length] = win
    idx = np.arange(n_frames)[:, None] * hop_length + np.arange(n_fft)[None, :]
    frames = x[:, idx] * wfull                                   # [B, T_frames, n_fft]
    n = np.arange(n_fft, dtype=np.float64)[:, None]
    fr = np.arange(n_fft // 2 + 1, dtype=np.float64)[None, :]
    ang = 2.0 * np.pi * n * fr / n_fft
    re = frames @ np.cos(ang)
    im = frames @ np.sin(ang)
    power = re ** 2 + im ** 2                                    # [B, T_frames, n_freq]
    mel_b = mel_filterbank(sample_rate, n_fft, n_mels, f_min, f_max).astype(np.float64)
    mel = power @ mel_b.T
    return np.log10(np.maximum(mel, min_amp))


# --------------------------------------------------------------------------- #
# Example run
# --------------------------------------------------------------------------- #
if __name__ == "__main__":
    # Small config consistent with LogMelFeatureExtractionV1Config
    sample_rate = 200
    n_fft = 64
    win_size = 0.32          # -> win_length = 64
    hop_size = 0.16          # -> hop_length = 32
    num_filters = 16
    f_min, f_max = 0.0, 100.0
    min_amp = 1e-10
    center = True

    win_length = int(win_size * sample_rate)
    hop_length = int(hop_size * sample_rate)

    B, T = 2, 512
    key = jax.random.PRNGKey(0)
    raw_audio = jax.random.normal(key, (B, T), dtype=jnp.float32)
    length = jnp.array([T, T - 3 * hop_length], dtype=jnp.int32)

    feats, frame_len = log_mel_features(
        raw_audio, length,
        sample_rate=sample_rate, n_fft=n_fft, win_length=win_length,
        hop_length=hop_length, n_mels=num_filters, f_min=f_min, f_max=f_max,
        min_amp=min_amp, center=center,
    )
    feats = jax.block_until_ready(feats)
    frame_len = jax.block_until_ready(frame_len)

    n_frames = 1 + T // hop_length
    assert feats.shape == (B, n_frames, num_filters), feats.shape
    assert feats.dtype == jnp.float32
    assert frame_len.dtype == jnp.int32
    assert np.array_equal(np.asarray(frame_len),
                          np.asarray(length) // hop_length + 1)
    assert np.isfinite(np.asarray(feats)).all()

    # Numerical check against the float64 numpy reference (bf16 compute path).
    ref = _reference_logmel_numpy(
        np.asarray(raw_audio), sample_rate=sample_rate, n_fft=n_fft,
        win_length=win_length, hop_length=hop_length, n_mels=num_filters,
        f_min=f_min, f_max=f_max, min_amp=min_amp, center=center)
    d = np.abs(np.asarray(feats, dtype=np.float64) - ref)
    assert d.mean() < 2e-2, ("mean abs log10 error", d.mean())
    assert np.percentile(d, 99) < 1e-1, ("p99 abs log10 error", np.percentile(d, 99))
    assert d.max() < 3.0, ("max abs log10 error", d.max())

    print("KERNEL_OK")
</pallas_src>

<mosaic_0001>
module attributes {stable_mosaic.version = 11 : i64} {
  func.func @kernel(%arg0: i32, %arg1: i32, %arg2: memref<1x32x32xbf16, #tpu.memory_space<vmem>>, %arg3: memref<1x16x32xbf16, #tpu.memory_space<vmem>>, %arg4: memref<128x256xbf16, #tpu.memory_space<vmem>>, %arg5: memref<128x128xbf16, #tpu.memory_space<vmem>>, %arg6: memref<1x32x128xf32, #tpu.memory_space<vmem>>, %arg7: memref<32x128xbf16, #tpu.memory_space<vmem>>) attributes {dimension_semantics = [#tpu.dimension_semantics<parallel>, #tpu.dimension_semantics<parallel>], iteration_bounds = array<i64: 2, 1>, scalar_prefetch = 0 : i64, scratch_operands = 1 : i64, tpu.core_type = #tpu.core_type<tc>, window_params = [{transform_indices = @transform_0, window_bounds = array<i64: 1, 32, 32>}, {transform_indices = @transform_1, window_bounds = array<i64: 1, 16, 32>}, {pipeline_mode = #tpu.pipeline_mode<synchronous>, transform_indices = @transform_2, window_bounds = array<i64: 128, 256>}, {pipeline_mode = #tpu.pipeline_mode<synchronous>, transform_indices = @transform_3, window_bounds = array<i64: 128, 128>}, {transform_indices = @transform_4, window_bounds = array<i64: 1, 32, 128>}]} {
    %cst = arith.constant 0.000000e+00 : bf16
    %0 = vector.broadcast %cst : bf16 to vector<32x64xbf16>
    %c0 = arith.constant 0 : index
    %c64 = arith.constant 64 : index
    %1 = vector.load %arg7[%c0, %c64] : memref<32x128xbf16, #tpu.memory_space<vmem>>, vector<32x64xbf16>
    tpu.vector_store %arg7[%c0, %c64], %0 {strides = array<i32>} : memref<32x128xbf16, #tpu.memory_space<vmem>>, vector<32x64xbf16>,
    %c0_0 = arith.constant 0 : index
    %c0_1 = arith.constant 0 : index
    %c0_2 = arith.constant 0 : index
    %2 = vector.load %arg2[%c0_0, %c0_1, %c0_2] : memref<1x32x32xbf16, #tpu.memory_space<vmem>>, vector<1x32x32xbf16>
    %3 = vector.shape_cast %2 : vector<1x32x32xbf16> to vector<32x32xbf16>
    %c0_3 = arith.constant 0 : index
    %c0_4 = arith.constant 0 : index
    %4 = vector.load %arg7[%c0_3, %c0_4] : memref<32x128xbf16, #tpu.memory_space<vmem>>, vector<32x32xbf16>
    tpu.vector_store %arg7[%c0_3, %c0_4], %3 {strides = array<i32>} : memref<32x128xbf16, #tpu.memory_space<vmem>>, vector<32x32xbf16>,
    %c0_5 = arith.constant 0 : index
    %c1 = arith.constant 1 : index
    %c0_6 = arith.constant 0 : index
    %5 = vector.load %arg2[%c0_5, %c1, %c0_6] : memref<1x32x32xbf16, #tpu.memory_space<vmem>>, vector<1x31x32xbf16>
    %6 = vector.shape_cast %5 : vector<1x31x32xbf16> to vector<31x32xbf16>
    %c0_7 = arith.constant 0 : index
    %c32 = arith.constant 32 : index
    %7 = vector.load %arg7[%c0_7, %c32] : memref<32x128xbf16, #tpu.memory_space<vmem>>, vector<31x32xbf16>
    tpu.vector_store %arg7[%c0_7, %c32], %6 {strides = array<i32>} : memref<32x128xbf16, #tpu.memory_space<vmem>>, vector<31x32xbf16>,
    %c0_8 = arith.constant 0 : index
    %c0_9 = arith.constant 0 : index
    %c0_10 = arith.constant 0 : index
    %8 = vector.load %arg3[%c0_8, %c0_9, %c0_10] : memref<1x16x32xbf16, #tpu.memory_space<vmem>>, vector<1x1x32xbf16>
    %9 = vector.shape_cast %8 : vector<1x1x32xbf16> to vector<1x32xbf16>
    %c31 = arith.constant 31 : index
    %c32_11 = arith.constant 32 : index
    %10 = vector.load %arg7[%c31, %c32_11] : memref<32x128xbf16, #tpu.memory_space<vmem>>, vector<1x32xbf16>
    tpu.vector_store %arg7[%c31, %c32_11], %9 {strides = array<i32>} : memref<32x128xbf16, #tpu.memory_space<vmem>>, vector<1x32xbf16>,
    %c0_12 = arith.constant 0 : index
    %c0_13 = arith.constant 0 : index
    %11 = vector.load %arg7[%c0_12, %c0_13] : memref<32x128xbf16, #tpu.memory_space<vmem>>, vector<32x128xbf16>
    %c0_14 = arith.constant 0 : index
    %c0_15 = arith.constant 0 : index
    %12 = vector.load %arg4[%c0_14, %c0_15] : memref<128x256xbf16, #tpu.memory_space<vmem>>, vector<128x256xbf16>
    %cst_16 = arith.constant dense<0.000000e+00> : vector<32x256xf32>
    %13 = tpu.matmul %11, %12, %cst_16 {dimension_numbers = #tpu.dot_dimension_numbers<[1], [0], [0], [1], [0, 0, 1, 1], [], []>} : vector<32x128xbf16>, vector<128x256xbf16>, vector<32x256xf32> -> vector<32x256xf32>
    %14 = vector.extract_strided_slice %13 {offsets = [0, 0], sizes = [32, 128], strides = [1, 1]} : vector<32x256xf32> to vector<32x128xf32>
    %15 = vector.extract_strided_slice %13 {offsets = [0, 128], sizes = [32, 128], strides = [1, 1]} : vector<32x256xf32> to vector<32x128xf32>
    %16 = arith.mulf %14, %14 : vector<32x128xf32>
    %17 = arith.mulf %15, %15 : vector<32x128xf32>
    %18 = arith.addf %16, %17 : vector<32x128xf32>
    %19 = arith.truncf %18 : vector<32x128xf32> to vector<32x128xbf16>
    %c0_17 = arith.constant 0 : index
    %c0_18 = arith.constant 0 : index
    %20 = vector.load %arg5[%c0_17, %c0_18] : memref<128x128xbf16, #tpu.memory_space<vmem>>, vector<128x128xbf16>
    %cst_19 = arith.constant dense<0.000000e+00> : vector<32x128xf32>
    %21 = tpu.matmul %19, %20, %cst_19 {dimension_numbers = #tpu.dot_dimension_numbers<[1], [0], [0], [1], [0, 0, 1, 1], [], []>} : vector<32x128xbf16>, vector<128x128xbf16>, vector<32x128xf32> -> vector<32x128xf32>
    %cst_20 = arith.constant 1.000000e-10 : f32
    %22 = vector.broadcast %cst_20 : f32 to vector<32x128xf32>
    %23 = arith.maximumf %21, %22 : vector<32x128xf32>
    %24 = math.log %23 : vector<32x128xf32>
    %cst_21 = arith.constant 0.434294492 : f32
    %25 = vector.broadcast %cst_21 : f32 to vector<32x128xf32>
    %26 = arith.mulf %24, %25 : vector<32x128xf32>
    %c0_22 = arith.constant 0 : index
    %c0_23 = arith.constant 0 : index
    %c0_24 = arith.constant 0 : index
    %27 = vector.load %arg6[%c0_22, %c0_23, %c0_24] : memref<1x32x128xf32, #tpu.memory_space<vmem>>, vector<1x32x128xf32>
    %28 = vector.shape_cast %27 : vector<1x32x128xf32> to vector<32x128xf32>
    %29 = vector.shape_cast %26 : vector<32x128xf32> to vector<1x32x128xf32>
    tpu.vector_store %arg6[%c0_22, %c0_23, %c0_24], %29 {strides = array<i32>} : memref<1x32x128xf32, #tpu.memory_space<vmem>>, vector<1x32x128xf32>,
    return
  }
  func.func @transform_0(%arg0: i32, %arg1: i32) -> (i32, i32, i32) {
    %c0_i32 = arith.constant 0 : i32
    %c0_i32_0 = arith.constant 0 : i32
    return %arg0, %arg1, %c0_i32 : i32, i32, i32
  }
  func.func @transform_1(%arg0: i32, %arg1: i32) -> (i32, i32, i32) {
    %c1_i32 = arith.constant 1 : i32
    %0 = arith.addi %arg1, %c1_i32 : i32
    %c2_i32 = arith.constant 2 : i32
    %1 = arith.muli %0, %c2_i32 : i32
    %c0_i32 = arith.constant 0 : i32
    %c0_i32_0 = arith.constant 0 : i32
    return %arg0, %1, %c0_i32 : i32, i32, i32
  }
  func.func @transform_2(%arg0: i32, %arg1: i32) -> (i32, i32) {
    %c0_i32 = arith.constant 0 : i32
    %c0_i32_0 = arith.constant 0 : i32
    %c0_i32_1 = arith.constant 0 : i32
    return %c0_i32, %c0_i32_0 : i32, i32
  }
  func.func @transform_3(%arg0: i32, %arg1: i32) -> (i32, i32) {
    %c0_i32 = arith.constant 0 : i32
    %c0_i32_0 = arith.constant 0 : i32
    %c0_i32_1 = arith.constant 0 : i32
    return %c0_i32, %c0_i32_0 : i32, i32
  }
  func.func @transform_4(%arg0: i32, %arg1: i32) -> (i32, i32, i32) {
    %c0_i32 = arith.constant 0 : i32
    %c0_i32_0 = arith.constant 0 : i32
    return %arg0, %arg1, %c0_i32 : i32, i32, i32
  }
}

</mosaic_0001>

<bundles_post_ra>
// kernel: tpu_custom_call.1
= control target key start
LH: loop header
LB: loop body
LE: loop exit
PB: predicated region body
PF: predicated region fallthrough
CT: control target
= control target key end

     0   :  { %9 = vsyncpa [#allocation4], 0  ;;  %s1423_s0 = inlined_call_operand.vmem [shape: bf16[2,48,32], index: 0, kind: input, shape index: {}]   ;;  %s1424_s1 = inlined_call_operand.vmem [shape: bf16[2,48,32], index: 1, kind: input, shape index: {}]   ;;  %s1425_s2 = inlined_call_operand.vmem [shape: bf16[128,256], index: 2, kind: input, shape index: {}]   ;;  %s1426_s3 = inlined_call_operand.hbm [shape: bf16[128,128], index: 3, kind: input, shape index: {}]   ;;  %s1427_s4 = inlined_call_operand.hbm [shape: f32[2,32,128], index: 4, kind: output, shape index: {}]  }
   0x1   :  { %10 = vsyncpa [#allocation5], 0 }
   0x2   :  { %12 = vsyncpa [#allocation5 + $0x1], 0  ;;  %s1189_s15 = smov 0   ;;  %s1191_s16 = smov 0  }
   0x3   :  { %s1193_s17 = smov 0   ;;  %s1195_s18 = smov 0  }
   0x4   :  { %s1197_s19 = smov 0   ;;  %s1199_s20 = smov 0  }
   0x5 LB: > { %s804_s21 = sadd.s32 4294967295, %s1155_s20   ;;  %s805_s22 = sadd.s32 4294967294, %s1155_s20   ;;  %s1155_s20 = sphi %s1199_s20, %s18_s20   ;;  %s1151_s19 = sphi %s1197_s19, %s1436_s19   ;;  %s1147_s18 = sphi %s1195_s18, %s1435_s18   ;;  %s1143_s17 = sphi %s1193_s17, %s1434_s17   ;;  %s1139_s16 = sphi %s1191_s16, %s1433_s16   ;;  %s1135_s15 = sphi %s1189_s15, %s1432_s15  }
   0x6   : > { %s30_s23 = sadd.s32 1, %s1151_s19  ;;  %s141_s24 = sadd.s32 1, %s1143_s17 }
   0x7   : > { %p32_p0 = scmp.ge.s32.totalorder %s30_s23, 2  ;;  %p151_p1 = scmp.ne.s32.totalorder %s1143_s17, %s1139_s16 }
   0x8   : > { %p152_p2 = scmp.eq.s32.totalorder %s804_s21, 1  ;;  %p157_p3 = scmp.ne.s32.totalorder %s1139_s16, %s1135_s15 }
   0x9   : > { %s1438_s23 = smov (%p32_p0, %s30_s23), 0  ;;  %p158_p5 = scmp.eq.s32.totalorder %s805_s22, 1 }
   0xa   : > { %p1229_p4 = por %p152_p2, %p151_p1  ;;  %s136_s26 = ssub.s32 %s1151_s19, %s1438_s23 }
   0xb   : > { %p806_p6 = scmp.ge.s32.totalorder %s1155_s20, 1  ;;  %p139_p7 = scmp.eq.s32.totalorder %s136_s26, 0 }
   0xc   : > { %p1236_p8 = por %p158_p5, %p157_p3  ;;  %p165_p9 = scmp.lt.s32.totalorder %s1155_s20, 3 }
   0xd   : > { %s1242_s28 = scalar_select %p139_p7, %s1143_s17, %s141_s24  }
   0xe   : > { %p166_p10 = pnand %p806_p6, %p165_p9  ;;  %p976_p11 = scmp.eq.s32.totalorder %s804_s21, 0 }
   0xf   : > { %s179_s5 = sshll.u32 %s1426_s3, 4  ;;  %s1157_s6 = smov [#allocation3]   ;;  %s180_s5 = int_to_ptr.hbm [resolvable:$true] %s179_s5 }
  0x10   : > { %p968_p12 = pneg %p166_p10  ;;  %s181_s7 = sshll.u32 %s1157_s6, 4  ;;  %s182_s7 = int_to_ptr.vmem [resolvable:$true] %s181_s7 }
  0x11   : > { %s1158_s8 = smov 64   ;;  %s1159_s9 = smov 4  }
  0x12   : > { %p969_p13 = pnand %p976_p11, %p968_p12  ;;  %235 = sbr.rel (%p166_p10) target bundleno = 485 (0x1e5), region = 36 }
  0x14   : > { %971 = dma.hbm_to_vmem [thread:$0]  (!%p969_p13), %s180_s5, 1024, %s182_s7, [#allocation4], %s1158_s8, %s1158_s8, %s1159_s9  }
  0x17   : > { %1126 = dma.done.wait (%p976_p11), [#allocation4], 1024  }
  0x18   : > { %1128 = vsyncadd (%p976_p11), [#allocation4], 4294966272  ;;  %p286_p0 = scmp.lt.s32.totalorder %s1147_s18, 1  ;;  %vm315_vm0 = vcmask 1043968   ;;  %v1160_v0 = vmov 0   ;;  %s1161_s6 = smov 32  }
  0x19   : > { %319 = vst.msk [vmem:[#allocation2 + $0xc] sm:$0xf] %vm315_vm0, %v1160_v0  ;;  %vm333_vm1 = vsmask.f32 3328  ;;  %vm334_vm2 = vsmask.f32 7440 }
  0x1a   : > { %s287_s10 = scalar_select %p286_p0, %s1147_s18, 1  ;;  %316 = vst.msk [vmem:[#allocation2] sm:$0xf] %vm315_vm0, %v1160_v0  ;;  %v880_v16 = vld [vmem:[%s1425_s2 + $0x70] sm:$0xf]  ;;  %vm1275_vm3 = vmor %vm333_vm1, %vm334_vm2  ;;  %vm324_vm4 = vcmask 257024  }
  0x1b   : > { %317 = vst.msk [vmem:[#allocation2 + $0x4] sm:$0xf] %vm315_vm0, %v1160_v0  ;;  %v942_v20 = vld [vmem:[%s1425_s2 + $0x74] sm:$0xf0]  ;;  %v941_v25 = vld [vmem:[%s1425_s2 + $0x74] sm:$0xf] }
  0x1c   : > { %s960_s11 = smul.u32 24, %s287_s10  ;;  %318 = vst.msk [vmem:[#allocation2 + $0x8] sm:$0xf] %vm315_vm0, %v1160_v0  ;;  %v881_v24 = vor.u32 %v942_v20, %v880_v16  ;;  %v882_v26 = vld [vmem:[%s1425_s2 + $0x78] sm:$0xf0]  ;;  %vm387_vm5 = vcmask 519424  }
  0x1d   : > { %v885_v30 = vor.u32 %v941_v25, %v882_v26  ;;  %v872_v31 = vld [vmem:[%s1425_s2 + $0x60] sm:$0xf]  ;;  %v940_v32 = vld [vmem:[%s1425_s2 + $0x64] sm:$0xf0]  ;;  %v939_v37 = vld [vmem:[%s1425_s2 + $0x64] sm:$0xf] }
  0x1e   : > { %s1252_s14 = scalar_lea.vmem %s1423_s0, %s960_s11  ;;  %s924_s21 = sadd.s32 16, %s960_s11  ;;  %522 = vmatpush.bf16.msra.mxu0 %v881_v24  ;;  %952 = vmatpush.bf16.msra.mxu3 %v881_v24  ;;  %v873_v36 = vor.u32 %v940_v32, %v872_v31  ;;  %v874_v39 = vld [vmem:[%s1425_s2 + $0x68] sm:$0xf0]  ;;  %v864_v40 = vld [vmem:[%s1425_s2 + $0x50] sm:$0xf]  ;;  %vm392_vm6 = vmand %vm387_vm5, %vm333_vm1  ;;  %vm404_vm7 = vcmask 519427  }
  0x1f   : > { %v332_v1 = vld [vmem:[%s1252_s14 + $0xc] sm:$0xf]  ;;  %v329_v2 = vld [vmem:[%s1252_s14] sm:$0xf]  ;;  %v330_v3 = vld [vmem:[%s1252_s14 + $0x4] sm:$0xf]  ;;  %s309_s26 = scalar_lea.vmem %s1424_s1, %s924_s21  ;;  %541 = vmatpush.bf16.msra.mxu1 %v885_v30  ;;  %v877_v43 = vor.u32 %v939_v37, %v874_v39 }
  0x20   : > { %v366_v4 = vshll.u32 %v332_v1, 16  ;;  %v370_v5 = vshrl.u32 %v332_v1, 16  ;;  %v337_v6 = vshrl.u32 %v329_v2, 16  ;;  %v340_v7 = vshll.u32 %v329_v2, 16  ;;  %v331_v10 = vld [vmem:[%s1252_s14 + $0x8] sm:$0xf] }
  0x21   : > { %v346_v8 = vshll.u32 %v330_v3, 16  ;;  %v350_v9 = vshrl.u32 %v330_v3, 16  ;;  %v396_v15 = vld [vmem:[%s309_s26] sm:$0x1]  ;;  %v356_v19 = vshll.u32 %v331_v10, 16  ;;  %v360_v23 = vshrl.u32 %v331_v10, 16 }
  0x22   : > { %v368_v11 = vrot.slane %v366_v4, 5  ;;  %v372_v12 = vrot.slane %v370_v5, 4  ;;  %v339_v13 = vrot.slane %v337_v6, 4  ;;  %v342_v14 = vrot.slane %v340_v7, 5  ;;  %v938_v44 = vld [vmem:[%s1425_s2 + $0x54] sm:$0xf0]  ;;  %523 = vmatpush.bf16.msra.mxu0 %v873_v36  ;;  %953 = vmatpush.bf16.msra.mxu3 %v873_v36 }
  0x23   : > { %v348_v17 = vrot.slane %v346_v8, 5  ;;  %v352_v18 = vrot.slane %v350_v9, 4  ;;  %v358_v29 = vrot.slane %v356_v19, 5  ;;  %v362_v35 = vrot.slane %v360_v23, 4  ;;  %v937_v45 = vld [vmem:[%s1425_s2 + $0x54] sm:$0xf]  ;;  %542 = vmatpush.bf16.msra.mxu1 %v877_v43 }
  0x24   : > { %v373_v21 = vor.u32 %v372_v12, %v368_v11  ;;  %v343_v22 = vor.u32 %v342_v14, %v339_v13  ;;  %v398_v38 = vshll.u32 %v396_v15, 16  ;;  %v866_v46 = vld [vmem:[%s1425_s2 + $0x58] sm:$0xf0]  ;;  %v865_v49 = vor.u32 %v938_v44, %v864_v40  ;;  %v323_v54 = vld [vmem:[%s1252_s14 + $0xc] sm:$0xf]  ;;  %v949_v30 = vld [vmem:[#allocation3 + $0x30] sm:$0xff] }
  0x25   : > { %v353_v28 = vor.u32 %v352_v18, %v348_v17  ;;  %v363_v42 = vor.u32 %v362_v35, %v358_v29  ;;  %v869_v50 = vor.u32 %v937_v45, %v866_v46  ;;  %328 = vst.msk [vmem:[#allocation2 + $0xc] sm:$0xf] %vm324_vm4, %v323_v54  ;;  %v856_v55 = vld [vmem:[%s1425_s2 + $0x40] sm:$0xf]  ;;  %v936_v56 = vld [vmem:[%s1425_s2 + $0x44] sm:$0xf0] }
  0x26   : > { %v374_v33 = vrot.slane %v373_v21, 4  ;;  %v344_v34 = vrot.slane %v343_v22, 4  ;;  %v400_v51 = vrot.slane %v398_v38, 5  ;;  %524 = vmatpush.bf16.msra.mxu0 %v865_v49  ;;  %954 = vmatpush.bf16.msra.mxu3 %v865_v49  ;;  %v935_v57 = vld [vmem:[%s1425_s2 + $0x44] sm:$0xf]  ;;  %v857_v58 = vor.u32 %v936_v56, %v856_v55  ;;  %v947_v36 = vld [vmem:[#allocation3 + $0x20] sm:$0xff] }
  0x27   : > { %v354_v47 = vrot.slane %v353_v28, 4  ;;  %v364_v48 = vrot.slane %v363_v42, 4  ;;  %543 = vmatpush.bf16.msra.mxu1 %v869_v50  ;;  %v858_v59 = vld [vmem:[%s1425_s2 + $0x48] sm:$0xf0]  ;;  %v320_v61 = vld [vmem:[%s1252_s14] sm:$0xf] }
  0x28   : > { %381 = vrot.lane.b32.xlu1 %v374_v33, %s1161_s6  ;;  %v349_v41 = vsel %vm1275_vm3, %v344_v34, %v348_v17  ;;  %v861_v60 = vor.u32 %v935_v57, %v858_v59  ;;  %325 = vst.msk [vmem:[#allocation2] sm:$0xf] %vm324_vm4, %v320_v61  ;;  %v848_v62 = vld [vmem:[%s1425_s2 + $0x30] sm:$0xf]  ;;  %v934_v63 = vld [vmem:[%s1425_s2 + $0x34] sm:$0xf0] }
  0x29   : > { %375 = vrot.lane.b32.xlu0 %v349_v41, %s1161_s6  ;;  %v369_v52 = vsel %vm1275_vm3, %v364_v48, %v368_v11  ;;  %v359_v53 = vsel %vm1275_vm3, %v354_v47, %v358_v29  ;;  %v933_v0 = vld [vmem:[%s1425_s2 + $0x34] sm:$0xf]  ;;  %v849_v1 = vor.u32 %v934_v63, %v848_v62  ;;  %v850_v2 = vld [vmem:[%s1425_s2 + $0x38] sm:$0xf0]  ;;  %v840_v3 = vld [vmem:[%s1425_s2 + $0x20] sm:$0xf] }
  0x2a   : > { %379 = vrot.lane.b32.xlu2 %v369_v52, %s1161_s6  ;;  %525 = vmatpush.bf16.msra.mxu0 %v857_v58  ;;  %v932_v4 = vld [vmem:[%s1425_s2 + $0x24] sm:$0xf0]  ;;  %v853_v5 = vor.u32 %v933_v0, %v850_v2  ;;  %v931_v6 = vld [vmem:[%s1425_s2 + $0x24] sm:$0xf]  ;;  %v842_v7 = vld [vmem:[%s1425_s2 + $0x28] sm:$0xf0] }
  0x2b   : > { %955 = vmatpush.bf16.msra.mxu3 %v857_v58  ;;  %544 = vmatpush.bf16.msra.mxu1 %v861_v60  ;;  %v841_v8 = vor.u32 %v932_v4, %v840_v3  ;;  %v845_v9 = vor.u32 %v931_v6, %v842_v7  ;;  %v321_v10 = vld [vmem:[%s1252_s14 + $0x4] sm:$0xf]  ;;  %v322_v11 = vld [vmem:[%s1252_s14 + $0x8] sm:$0xf]  ;;  %v832_v12 = vld [vmem:[%s1425_s2 + $0x10] sm:$0xf] }
  0x2c   : > { %326 = vst.msk [vmem:[#allocation2 + $0x4] sm:$0xf] %vm324_vm4, %v321_v10  ;;  %v930_v13 = vld [vmem:[%s1425_s2 + $0x14] sm:$0xf0]  ;;  %v929_v14 = vld [vmem:[%s1425_s2 + $0x14] sm:$0xf] }
  0x2d   : > { %327 = vst.msk [vmem:[#allocation2 + $0x8] sm:$0xf] %vm324_vm4, %v322_v11  ;;  %v833_v15 = vor.u32 %v930_v13, %v832_v12  ;;  %v834_v16 = vld [vmem:[%s1425_s2 + $0x18] sm:$0xf0]  ;;  %v824_v17 = vld [vmem:[%s1425_s2] sm:$0xf] }
  0x2e   : > { %526 = vmatpush.bf16.msra.mxu0 %v849_v1  ;;  %v928_v18 = vld [vmem:[%s1425_s2 + $0x4] sm:$0xf0]  ;;  %v837_v20 = vor.u32 %v929_v14, %v834_v16  ;;  %v927_v21 = vld [vmem:[%s1425_s2 + $0x4] sm:$0xf]  ;;  %v826_v22 = vld [vmem:[%s1425_s2 + $0x8] sm:$0xf0] }
  0x2f   : > { %956 = vmatpush.bf16.msra.mxu3 %v849_v1  ;;  %545 = vmatpush.bf16.msra.mxu1 %v853_v5  ;;  %v825_v23 = vor.u32 %v928_v18, %v824_v17  ;;  %v829_v24 = vor.u32 %v927_v21, %v826_v22  ;;  %v393_v25 = vld [vmem:[#allocation2 + $0xc] sm:$0xf]  ;;  %vm405_vm8 = vsmask.f32 7950  ;;  %v948_v34 = vld [vmem:[#allocation3 + $0x28] sm:$0xff]  ;;  %v945_v40 = vld [vmem:[#allocation3 + $0x10] sm:$0xff] }
  0x30   : > { %401 = vrot.lane.b32.xlu1 %v400_v51, %s1161_s6  ;;  %v950_v29 = vld [vmem:[#allocation3 + $0x38] sm:$0xff]  ;;  %vm406_vm9 = vmand %vm404_vm7, %vm405_vm8  ;;  %v944_v41 = vld [vmem:[#allocation3 + $0x8] sm:$0xff]  ;;  %s278_s7 = sand.u32 1, %s1139_s16   ;;  %s951_s10 = sshll.u32 %s1147_s18, 5 }
  0x31   : > { %377 = vrot.lane.b32.xlu0 %v359_v53, %s1161_s6  ;;  %638 = vmatpush.bf16.msra.mxu2 %v950_v29  ;;  %v946_v39 = vld [vmem:[#allocation3 + $0x18] sm:$0xff]  ;;  %v943_v42 = vld [vmem:[#allocation3] sm:$0xff]  ;;  %s811_s8 = sshll.u32 %s278_s7, 5  ;;  %s691_s13 = scalar_lea.hbm %s1427_s4, %s951_s10 }
  0x32   : > { %527 = vmatpush.bf16.msra.mxu0 %v841_v8  ;;  %s280_s9 = scalar_lea.vmem [#allocation6], %s811_s8  ;;  %s694_s14 = sshll.u32 %s691_s13, 4  ;;  %s695_s14 = int_to_ptr.hbm [resolvable:$true] %s694_s14 }
  0x33   : > { %957 = vmatpush.bf16.msra.mxu3 %v841_v8  ;;  %546 = vmatpush.bf16.msra.mxu1 %v845_v9  ;;  %s692_s21 = sshll.u32 %s280_s9, 4  ;;  %s678_s22 = scalar_lea.sflag [#allocation5], %s278_s7  ;;  %s693_s21 = int_to_ptr.vmem [resolvable:$true] %s692_s21 }
  0x34   : > { %s1087_s24 = sshra.s32 %s695_s14, 4  ;;  %s1093_s30 = scalar_lea.hbm %s1427_s4, 64  ;;  %s1088_s24 = int_to_ptr.hbm [resolvable:$true] %s1087_s24 }
  0x35   : > { %639 = vmatpush.bf16.msra.mxu2 %v949_v30  ;;  %s1089_s18 = scalar_lea.hbm %s1088_s24, 32  ;;  %p1094_p5 = scmp.lt.s32.totalorder %s1088_s24, %s1427_s4 }
  0x36   : > { %528 = vmatpush.bf16.msra.mxu0 %v833_v15  ;;  %p1090_p1 = scmp.ne.s32.totalorder %s1088_s24, %s1089_s18  ;;  %p1095_p6 = scmp.lt.s32.totalorder %s1093_s30, %s1089_s18 }
  0x37   : > { %958 = vmatpush.bf16.msra.mxu3 %v833_v15  ;;  %547 = vmatpush.bf16.msra.mxu1 %v837_v20 }
  0x38   : > { %p1091_p2 = pnand %p1090_p1, %p1229_p4  ;;  %p1096_p7 = por %p1095_p6, %p1094_p5 }
  0x39   : > { %640 = vmatpush.bf16.msra.mxu2 %v948_v34 }
  0x3a   : > { %529 = vmatpush.bf16.msra.mxu0 %v825_v23  ;;  %p1092_p3 = pneg %p1091_p2 }
  0x3b   : > { %959 = vmatpush.bf16.msra.mxu3 %v825_v23  ;;  %548 = vmatpush.bf16.msra.mxu1 %v829_v24 }
  0x3c   : > { %p1097_p9 = pnand %p1096_p7, %p1092_p3 }
  0x3d   : > { %641 = vmatpush.bf16.msra.mxu2 %v947_v36 }
  0x41   : > { %642 = vmatpush.bf16.msra.mxu2 %v946_v39 }
  0x45   : > { %643 = vmatpush.bf16.msra.mxu2 %v945_v40 }
  0x49   : > { %644 = vmatpush.bf16.msra.mxu2 %v944_v41 }
  0x4d   : > { %645 = vmatpush.bf16.msra.mxu2 %v943_v42 }
  0x84   : > { %v380_v19 = vpop.permute.xlu2 %379 }
  0x85   : > { %390 = vst.msk [vmem:[#allocation2 + $0x8] sm:$0xf] %vm387_vm5, %v380_v19 }
  0x9a   : > { %v382_v26 = vpop.permute.xlu1 %381 }
  0x9b   : > { %v394_v27 = vsel %vm392_vm6, %v382_v26, %v393_v25  ;;  %v376_v28 = vpop.permute.xlu0 %375 }
  0x9c   : > { %395 = vst [vmem:[#allocation2 + $0xc] sm:$0xf] %v394_v27 }
  0x9d   : > { %388 = vst.msk [vmem:[#allocation2] sm:$0xf] %vm387_vm5, %v376_v28 }
  0xa2   : > { %v402_v31 = vpop.permute.xlu1 %401 }
  0xa3   : > { %v407_v32 = vld [vmem:[#allocation2 + $0xc] sm:$0x8]  ;;  %v378_v33 = vpop.permute.xlu0 %377 }
  0xa4   : > { %v408_v35 = vsel %vm406_vm9, %v402_v31, %v407_v32  ;;  %389 = vst.msk [vmem:[#allocation2 + $0x4] sm:$0xf] %vm387_vm5, %v378_v33 }
  0xa5   : > { %409 = vst [vmem:[#allocation2 + $0xc] sm:$0x8] %v408_v35 }
  0xab   : > { %v925_v37 = vld [vmem:[#allocation2] sm:$0xff] }
  0xac   : > { %v926_v38 = vld [vmem:[#allocation2 + $0x8] sm:$0xff]  ;;  %530 = vmatmul.bf16.vlgmr.msra.gmra.mxu0 %v925_v37  ;;  %549 = vmatmul.bf16.vlgmr.msra.gmra.mxu1 %v925_v37 }
  0xad   : > { %535 = vmatmul.bf16.vlgmr.msra.gmra.mxu3 %v926_v38 }
  0xbc   : > { %554 = vmatmul.bf16.gmra.mxu1 %v926_v38 }
 0x129   : > { %v531_v43 = vpop.f32.mrf.mxu0  ;;  %v550_v44 = vpop.f32.mrf.mxu1 }
 0x12a   : > { %v560_v45 = vmul.f32 %v531_v43, %v531_v43  ;;  %v564_v46 = vmul.f32 %v550_v44, %v550_v44 }
 0x12c   : > { %v568_v51 = vadd.f32 %v564_v46, %v560_v45 }
 0x130   : > { %v536_v53 = vpop.f32.mrf.mxu3 }
 0x131   : > { %v533_v47 = vpop.f32.mrf.mxu0  ;;  %v552_v48 = vpop.f32.mrf.mxu1  ;;  %v562_v59 = vmul.f32 %v536_v53, %v536_v53 }
 0x132   : > { %v561_v49 = vmul.f32 %v533_v47, %v533_v47  ;;  %v565_v50 = vmul.f32 %v552_v48, %v552_v48 }
 0x134   : > { %v569_v52 = vadd.f32 %v565_v50, %v561_v49 }
 0x136   : > { %v572_v54 = vpack.c.bf16 %v569_v52, %v568_v51 }
 0x138   : > { %646 = vmatmul.bf16.vlgmr.msra.gmra.mxu2 %v572_v54  ;;  %v538_v56 = vpop.f32.mrf.mxu3 }
 0x139   : > { %v555_v55 = vpop.f32.mrf.mxu1  ;;  %v563_v60 = vmul.f32 %v538_v56, %v538_v56 }
 0x13a   : > { %v566_v57 = vmul.f32 %v555_v55, %v555_v55 }
 0x13c   : > { %v570_v62 = vadd.f32 %v566_v57, %v562_v59 }
 0x141   : > { %v557_v58 = vpop.f32.mrf.mxu1 }
 0x142   : > { %v567_v61 = vmul.f32 %v557_v58, %v557_v58 }
 0x144   : > { %v571_v63 = vadd.f32 %v567_v61, %v563_v60 }
 0x146   : > { %v573_v0 = vpack.c.bf16 %v571_v63, %v570_v62 }
 0x148   : > { %651 = vmatmul.bf16.gmra.mxu2 %v573_v0 }
 0x1bb   : > { %v647_v1 = vpop.f32.mrf.mxu2 }
 0x1bc   : > { %v657_v2 = vmax.f32 %v647_v1, 1e-10 }
 0x1be   : > { %1035 = vlog2.f32 %v657_v2 }
 0x1c3   : > { %v649_v3 = vpop.f32.mrf.mxu2 }
 0x1c4   : > { %v1036_v4 = vpop.eup %1035  ;;  %v658_v5 = vmax.f32 %v649_v3, 1e-10 }
 0x1c5   : > { %v662_v6 = vmul.f32 0.6931472, %v1036_v4 }
 0x1c6   : > { %1037 = vlog2.f32 %v658_v5 }
 0x1c7   : > { %v669_v7 = vmul.f32 0.4342945, %v662_v6 }
 0x1c9   : > { %673 = vst [vmem:[%s280_s9] sm:$0xff] %v669_v7 }
 0x1cb   : > { %v652_v8 = vpop.f32.mrf.mxu2 }
 0x1cc   : > { %v1038_v9 = vpop.eup %1037  ;;  %v659_v10 = vmax.f32 %v652_v8, 1e-10 }
 0x1cd   : > { %v664_v11 = vmul.f32 0.6931472, %v1038_v9 }
 0x1ce   : > { %1039 = vlog2.f32 %v659_v10 }
 0x1cf   : > { %v670_v12 = vmul.f32 0.4342945, %v664_v11 }
 0x1d1   : > { %674 = vst [vmem:[%s280_s9 + $0x8] sm:$0xff] %v670_v12 }
 0x1d3   : > { %v654_v13 = vpop.f32.mrf.mxu2 }
 0x1d4   : > { %v1040_v14 = vpop.eup %1039  ;;  %v660_v15 = vmax.f32 %v654_v13, 1e-10 }
 0x1d5   : > { %v666_v16 = vmul.f32 0.6931472, %v1040_v14 }
 0x1d6   : > { %1041 = vlog2.f32 %v660_v15 }
 0x1d7   : > { %v671_v17 = vmul.f32 0.4342945, %v666_v16 }
 0x1d9   : > { %675 = vst [vmem:[%s280_s9 + $0x10] sm:$0xff] %v671_v17 }
 0x1dc   : > { %v1042_v18 = vpop.eup %1041 }
 0x1dd   : > { %v668_v19 = vmul.f32 0.6931472, %v1042_v18 }
 0x1df   : > { %v672_v20 = vmul.f32 0.4342945, %v668_v19 }
 0x1e1   : > { %676 = vst [vmem:[%s280_s9 + $0x18] sm:$0xff] %v672_v20 }
 0x1e2   : > { %1100 = shalt.err (!%p1097_p9)
}
 0x1e3   : > { %s1162_s7 = smov 128   ;;  %s1163_s8 = smov 8  }
 0x1e4   : > { %966 = dma.vmem_to_hbm [thread:$0]  (%p1229_p4), %s693_s21, 512, %s695_s14, %s678_s22, %s1162_s7, %s1162_s7, %s1163_s8  }
 0x1e5 PF: > { %p979_p10 = scmp.ge.s32.totalorder %s1155_s20, 2  ;;  %s709_s9 = sand.u32 1, %s1135_s15  }
 0x1e6   : > { %s710_s10 = scalar_lea.sflag [#allocation5], %s709_s9 }
 0x1e7   : > { %p973_p11 = pnand %p979_p10, %p1236_p8 }
 0x1e9   : > { %p974_p12 = pneg %p973_p11 }
 0x1eb   : > { %1130 = dma.done.wait (%p974_p12), %s710_s10, 512  }
 0x1ec   : > { %1132 = vsyncadd (%p974_p12), %s710_s10, 4294966784  ;;  %s18_s20 = sadd.s32 1, %s1155_s20   ;;  %s1432_s15 = smov %s1139_s16 }
 0x1ed   : > { %p15_p13 = scmp.ge.s32.totalorder %s18_s20, 4   ;;  %s1433_s16 = smov %s1143_s17 }
 0x1ee   : > { %s1434_s17 = smov %s1242_s28  ;;  %s1435_s18 = smov %s1151_s19 }
 0x1ef   : > { %s1436_s19 = smov %s1438_s23  ;;  %17 = sbr.rel (!%p15_p13) target bundleno = 5 (0x5), region = 79 }
 0x1f4   :  { %716 = vsyncpa [#allocation4], 1 }
 0x1f5   :  { %718 = vsyncpa [#allocation4 + $0x1], 1 }
 0x1f6   :  { %719 = vsyncpa [#allocation5], 1 }
 0x1f7   :  { %721 = vsyncpa [#allocation5 + $0x1], 1 }

</bundles_post_ra>
